<compile_context>
chip_gen: v5e
topology: v5e:2x2
jax: 0.10.0
libtpu: 0.0.40
codegen_flags: <defaults>
</compile_context>

<pallas_src>
import jax
import jax.numpy as jnp
from jax.experimental import pallas as pl
from jax.experimental.pallas import tpu as pltpu


def _qfunc_kernel(o_ref, a_ref, w1o_ref, w1a_ref, b1_ref,
                  w2_ref, b2_ref, w3t_ref, b3_ref, q_ref):
    # Layer 1: fused concat -> two accumulating MXU matmuls.
    h = jnp.dot(o_ref[...], w1o_ref[...], preferred_element_type=jnp.float32)
    h = h + jnp.dot(a_ref[...], w1a_ref[...], preferred_element_type=jnp.float32)
    h = jnp.maximum(h + b1_ref[...], 0.0)                      # ReLU
    # Layer 2.
    h = jnp.dot(h, w2_ref[...], preferred_element_type=jnp.float32) + b2_ref[...]
    h = jnp.maximum(h, 0.0)                                    # ReLU
    # Output layer (out width 1): VPU multiply + lane reduction instead of an
    # N=1 MXU matmul that would waste the systolic array's output dimension.
    q = jnp.sum(h * w3t_ref[...], axis=-1, keepdims=True) + b3_ref[...]
    q_ref[...] = q.astype(q_ref.dtype)                         # [tile, 1]


def mlp_q_forward(o, a, params, *, batch_tile=1024):
    """Pallas-backed forward of MLPQFunction. Returns q of shape [B]."""
    w1, b1, w2, b2, w3, b3 = params
    B, odim = o.shape
    adim = a.shape[-1]
    H1 = w1.shape[1]
    H2 = w2.shape[1]

    # Split W1 so the concat([o, a]) never materializes; row layout [1, H2] for W3
    # so the last layer is a broadcast-multiply.
    w1o = w1[:odim]                    # [odim, H1]
    w1a = w1[odim:]                    # [adim, H1]
    w3t = jnp.reshape(w3, (1, H2))     # [1, H2]

    if B <= batch_tile:
        # Small batch: single invocation, whole problem resident in VMEM.
        # No grid -> no pipeline scaffolding / double buffering overhead.
        vmem = pl.BlockSpec(memory_space=pltpu.MemorySpace.VMEM)
        q2d = pl.pallas_call(
            _qfunc_kernel,
            out_shape=jax.ShapeDtypeStruct((B, 1), jnp.float32),
            in_specs=[vmem] * 9,
            out_specs=vmem,
        )(o, a, w1o, w1a, b1, w2, b2, w3t, b3)
        return jnp.squeeze(q2d, -1)

    # Large batch: tile over batch; weights/biases stay resident in VMEM
    # (constant index_map) while only activations stream from HBM.
    tm = batch_tile
    Bp = ((B + tm - 1) // tm) * tm
    if Bp != B:
        pad = Bp - B
        o = jnp.pad(o, ((0, pad), (0, 0)))
        a = jnp.pad(a, ((0, pad), (0, 0)))

    resident = lambda shape: pl.BlockSpec(shape, lambda i: (0, 0))

    q2d = pl.pallas_call(
        _qfunc_kernel,
        out_shape=jax.ShapeDtypeStruct((Bp, 1), jnp.float32),
        grid=(Bp // tm,),
        in_specs=[
            pl.BlockSpec((tm, odim), lambda i: (i, 0)),   # o tile
            pl.BlockSpec((tm, adim), lambda i: (i, 0)),   # a tile
            resident((odim, H1)),                         # W1_o
            resident((adim, H1)),                         # W1_a
            resident((1, H1)),                            # b1
            resident((H1, H2)),                           # W2
            resident((1, H2)),                            # b2
            resident((1, H2)),                            # W3 row
            resident((1, 1)),                             # b3
        ],
        # Output block is (tm, 1); its store volume is <3% of the streamed input,
        # so a lane-dense (1, tm) transposed layout is not worth the relayout here.
        out_specs=pl.BlockSpec((tm, 1), lambda i: (i, 0)),
        compiler_params=pltpu.CompilerParams(
            dimension_semantics=("parallel",)),           # megacore sharding on v7x
    )(o, a, w1o, w1a, b1, w2, b2, w3t, b3)

    return jnp.squeeze(q2d[:B], -1)


def init_params(key, odim, adim, hdims):
    """Deterministic synthetic init. Weights stored as [in, out]; biases as [1, out]."""
    dims = [odim + adim] + list(hdims) + [1]
    params = []
    for i in range(len(dims) - 1):
        fan_in, fan_out = dims[i], dims[i + 1]
        key, kw, kb = jax.random.split(key, 3)
        bound = 1.0 / jnp.sqrt(fan_in)
        w = jax.random.uniform(kw, (fan_in, fan_out), jnp.float32, -bound, bound)
        b = jax.random.uniform(kb, (1, fan_out), jnp.float32, -bound, bound)
        params += [w, b]
    return params


def reference_forward(o, a, params):
    w1, b1, w2, b2, w3, b3 = params
    x = jnp.concatenate([o, a], axis=-1)
    h = jax.nn.relu(x @ w1 + b1)
    h = jax.nn.relu(h @ w2 + b2)
    q = h @ w3 + b3
    return jnp.squeeze(q, -1)


if __name__ == "__main__":
    odim, adim = 24, 8
    hdims = (32, 32)

    key = jax.random.PRNGKey(0)
    key, ko, ka, kp = jax.random.split(key, 4)
    params = init_params(kp, odim, adim, hdims)

    # Small batch (gridless VMEM-resident path), matches the module's typical use.
    o = jax.random.normal(ko, (2, odim), jnp.float32)
    a = jax.random.normal(ka, (2, adim), jnp.float32)
    q = mlp_q_forward(o, a, params)
    jax.block_until_ready(q)
    q_ref = reference_forward(o, a, params)
    assert q.shape == (2,)
    assert jnp.allclose(q, q_ref, atol=1e-4, rtol=1e-4)

    # Replay-batch sized input exercises the batch-tiled grid with resident weights.
    key, ko2, ka2 = jax.random.split(key, 3)
    o2 = jax.random.normal(ko2, (2048, odim), jnp.float32)
    a2 = jax.random.normal(ka2, (2048, adim), jnp.float32)
    q2 = mlp_q_forward(o2, a2, params)
    jax.block_until_ready(q2)
    q2_ref = reference_forward(o2, a2, params)
    assert q2.shape == (2048,)
    assert jnp.allclose(q2, q2_ref, atol=1e-4, rtol=1e-4)

    print("KERNEL_OK")
</pallas_src>

<mosaic_0001>
module attributes {stable_mosaic.version = 11 : i64} {
  func.func @_qfunc_kernel(%arg0: memref<2x24xf32, #tpu.memory_space<vmem>>, %arg1: memref<2x8xf32, #tpu.memory_space<vmem>>, %arg2: memref<24x32xf32, #tpu.memory_space<vmem>>, %arg3: memref<8x32xf32, #tpu.memory_space<vmem>>, %arg4: memref<1x32xf32, #tpu.memory_space<vmem>>, %arg5: memref<32x32xf32, #tpu.memory_space<vmem>>, %arg6: memref<1x32xf32, #tpu.memory_space<vmem>>, %arg7: memref<1x32xf32, #tpu.memory_space<vmem>>, %arg8: memref<1x1xf32, #tpu.memory_space<vmem>>, %arg9: memref<2x1xf32, #tpu.memory_space<vmem>>) attributes {dimension_semantics = [], scalar_prefetch = 0 : i64, scratch_operands = 0 : i64, tpu.core_type = #tpu.core_type<tc>} {
    %c0 = arith.constant 0 : index
    %c0_0 = arith.constant 0 : index
    %0 = vector.load %arg0[%c0, %c0_0] : memref<2x24xf32, #tpu.memory_space<vmem>>, vector<2x24xf32>
    %c0_1 = arith.constant 0 : index
    %c0_2 = arith.constant 0 : index
    %1 = vector.load %arg2[%c0_1, %c0_2] : memref<24x32xf32, #tpu.memory_space<vmem>>, vector<24x32xf32>
    %cst = arith.constant dense<0.000000e+00> : vector<2x32xf32>
    %2 = tpu.matmul %0, %1, %cst {dimension_numbers = #tpu.dot_dimension_numbers<[1], [0], [0], [1], [0, 0, 1, 1], [], []>} : vector<2x24xf32>, vector<24x32xf32>, vector<2x32xf32> -> vector<2x32xf32>
    %c0_3 = arith.constant 0 : index
    %c0_4 = arith.constant 0 : index
    %3 = vector.load %arg1[%c0_3, %c0_4] : memref<2x8xf32, #tpu.memory_space<vmem>>, vector<2x8xf32>
    %c0_5 = arith.constant 0 : index
    %c0_6 = arith.constant 0 : index
    %4 = vector.load %arg3[%c0_5, %c0_6] : memref<8x32xf32, #tpu.memory_space<vmem>>, vector<8x32xf32>
    %cst_7 = arith.constant dense<0.000000e+00> : vector<2x32xf32>
    %5 = tpu.matmul %3, %4, %cst_7 {dimension_numbers = #tpu.dot_dimension_numbers<[1], [0], [0], [1], [0, 0, 1, 1], [], []>} : vector<2x8xf32>, vector<8x32xf32>, vector<2x32xf32> -> vector<2x32xf32>
    %6 = arith.addf %2, %5 : vector<2x32xf32>
    %c0_8 = arith.constant 0 : index
    %c0_9 = arith.constant 0 : index
    %7 = vector.load %arg4[%c0_8, %c0_9] : memref<1x32xf32, #tpu.memory_space<vmem>>, vector<1x32xf32>
    %8 = vector.broadcast %7 : vector<1x32xf32> to vector<2x32xf32>
    %9 = arith.addf %6, %8 : vector<2x32xf32>
    %cst_10 = arith.constant 0.000000e+00 : f32
    %10 = vector.broadcast %cst_10 : f32 to vector<2x32xf32>
    %11 = arith.maximumf %9, %10 : vector<2x32xf32>
    %c0_11 = arith.constant 0 : index
    %c0_12 = arith.constant 0 : index
    %12 = vector.load %arg5[%c0_11, %c0_12] : memref<32x32xf32, #tpu.memory_space<vmem>>, vector<32x32xf32>
    %cst_13 = arith.constant dense<0.000000e+00> : vector<2x32xf32>
    %13 = tpu.matmul %11, %12, %cst_13 {dimension_numbers = #tpu.dot_dimension_numbers<[1], [0], [0], [1], [0, 0, 1, 1], [], []>} : vector<2x32xf32>, vector<32x32xf32>, vector<2x32xf32> -> vector<2x32xf32>
    %c0_14 = arith.constant 0 : index
    %c0_15 = arith.constant 0 : index
    %14 = vector.load %arg6[%c0_14, %c0_15] : memref<1x32xf32, #tpu.memory_space<vmem>>, vector<1x32xf32>
    %15 = vector.broadcast %14 : vector<1x32xf32> to vector<2x32xf32>
    %16 = arith.addf %13, %15 : vector<2x32xf32>
    %cst_16 = arith.constant 0.000000e+00 : f32
    %17 = vector.broadcast %cst_16 : f32 to vector<2x32xf32>
    %18 = arith.maximumf %16, %17 : vector<2x32xf32>
    %c0_17 = arith.constant 0 : index
    %c0_18 = arith.constant 0 : index
    %19 = vector.load %arg7[%c0_17, %c0_18] : memref<1x32xf32, #tpu.memory_space<vmem>>, vector<1x32xf32>
    %20 = vector.broadcast %19 : vector<1x32xf32> to vector<2x32xf32>
    %21 = arith.mulf %18, %20 : vector<2x32xf32>
    %cst_19 = arith.constant dense<0.000000e+00> : vector<2xf32>
    %22 = vector.multi_reduction <add>, %21, %cst_19 [1] : vector<2x32xf32> to vector<2xf32>
    %23 = vector.shape_cast %22 : vector<2xf32> to vector<2x1xf32>
    %c0_20 = arith.constant 0 : index
    %c0_21 = arith.constant 0 : index
    %24 = vector.load %arg8[%c0_20, %c0_21] : memref<1x1xf32, #tpu.memory_space<vmem>>, vector<1x1xf32>
    %25 = vector.broadcast %24 : vector<1x1xf32> to vector<2x1xf32>
    %26 = arith.addf %23, %25 : vector<2x1xf32>
    %c0_22 = arith.constant 0 : index
    %c0_23 = arith.constant 0 : index
    %27 = vector.load %arg9[%c0_22, %c0_23] : memref<2x1xf32, #tpu.memory_space<vmem>>, vector<2x1xf32>
    tpu.vector_store %arg9[%c0_22, %c0_23], %26 {strides = array<i32>} : memref<2x1xf32, #tpu.memory_space<vmem>>, vector<2x1xf32>,
    return
  }
}

</mosaic_0001>

<bundles_post_ra>
// kernel: tpu_custom_call.1
= control target key start
LH: loop header
LB: loop body
LE: loop exit
PB: predicated region body
PF: predicated region fallthrough
CT: control target
= control target key end

     0   :  { %s410_s0 = inlined_call_operand.vmem [shape: f32[2,24], index: 0, kind: input, shape index: {}]   ;;  %s411_s1 = inlined_call_operand.hbm [shape: f32[2,8], index: 1, kind: input, shape index: {}]   ;;  %s412_s2 = inlined_call_operand.hbm [shape: f32[24,32], index: 2, kind: input, shape index: {}]   ;;  %s413_s3 = inlined_call_operand.hbm [shape: f32[8,32], index: 3, kind: input, shape index: {}]   ;;  %s414_s4 = inlined_call_operand.vmem [shape: f32[1,32], index: 4, kind: input, shape index: {}]   ;;  %s415_s5 = inlined_call_operand.hbm [shape: f32[32,32], index: 5, kind: input, shape index: {}]   ;;  %s416_s6 = inlined_call_operand.vmem [shape: f32[1,32], index: 6, kind: input, shape index: {}]   ;;  %s417_s7 = inlined_call_operand.vmem [shape: f32[1,32], index: 7, kind: input, shape index: {}]   ;;  %s418_s8 = inlined_call_operand.<no memory space> [shape: f32[1,1], index: 8, kind: input, shape index: {}]   ;;  %s419_s9 = inlined_call_operand.vmem [shape: f32[2,1], index: 9, kind: output, shape index: {}]  }
   0x1   :  { %v14_v0 = vstv %s418_s8 }
   0x2   :  { %15 = vst [vmem:[#allocation2] sm:$0x1] %v14_v0 }
   0x3   :  { %16 = vsyncpa [#allocation4], 0 }
   0x4   :  { %17 = vsyncpa [#allocation6], 0  ;;  %s36_s13 = sshll.u32 %s412_s2, 4  ;;  %s37_s13 = int_to_ptr.hbm [resolvable:$true] %s36_s13 }
   0x5   :  { %18 = vsyncpa [#allocation9], 0  ;;  %s324_s14 = smov [#allocation5]   ;;  %s26_s18 = sshll.u32 %s411_s1, 4  ;;  %s27_s18 = int_to_ptr.hbm [resolvable:$true] %s26_s18 }
   0x6   :  { %s38_s15 = sshll.u32 %s324_s14, 4  ;;  %s325_s19 = smov 128   ;;  %s39_s15 = int_to_ptr.vmem [resolvable:$true] %s38_s15 }
   0x7   :  { %s326_s20 = smov 8   ;;  %s327_s8 = smov [#allocation3]  }
   0x8   :  { %44 = dma.hbm_to_vmem [thread:$0]  %s37_s13, 384, %s39_s15, [#allocation6], %s325_s19, %s325_s19, %s326_s20  }
   0x9   :  { %s28_s21 = sshll.u32 %s327_s8, 4  ;;  %s50_s24 = sshll.u32 %s413_s3, 4  ;;  %s29_s21 = int_to_ptr.vmem [resolvable:$true] %s28_s21  ;;  %s51_s24 = int_to_ptr.hbm [resolvable:$true] %s50_s24 }
   0xa   :  { %31 = dma.hbm_to_vmem [thread:$0]  %s27_s18, 32, %s29_s21, [#allocation4]  }
   0xb   :  { %s62_s26 = sshll.u32 %s415_s5, 4  ;;  %s328_s27 = smov [#allocation7]   ;;  %s63_s26 = int_to_ptr.hbm [resolvable:$true] %s62_s26 }
   0xc   :  { %s52_s28 = sshll.u32 %s328_s27, 4  ;;  %s329_s1 = smov [#allocation8]   ;;  %s53_s28 = int_to_ptr.vmem [resolvable:$true] %s52_s28 }
   0xd   :  { %55 = dma.hbm_to_vmem [thread:$0]  %s51_s24, 128, %s53_s28, [#allocation6]  }
   0xe   :  { %s64_s29 = sshll.u32 %s329_s1, 4  ;;  %s65_s29 = int_to_ptr.vmem [resolvable:$true] %s64_s29 }
   0xf   :  { %70 = dma.hbm_to_vmem [thread:$0]  %s63_s26, 512, %s65_s29, [#allocation9], %s325_s19, %s325_s19, %s326_s20  }
  0x10   :  { %318 = dma.done.wait [#allocation4], 32  }
  0x11   :  { %319 = vsyncadd [#allocation4], 4294967264 }
  0x12   :  { %320 = dma.done.wait [#allocation6], 512  }
  0x13   :  { %321 = vsyncadd [#allocation6], 4294966784 }
  0x14   :  { %322 = dma.done.wait [#allocation9], 512  }
  0x15   :  { %323 = vsyncadd [#allocation9], 4294966784  ;;  %vm99_vm0 = vcmask 64512   ;;  %v96_v1 = vld [vmem:[#allocation5 + $0x10] sm:$0xff]  ;;  %v95_v2 = vld [vmem:[#allocation5 + $0x8] sm:$0xff]  ;;  %vm123_vm1 = vcmask 195584  }
  0x16   :  { %v98_v3 = vld [vmem:[#allocation7] sm:$0xff]  ;;  %140 = vmatpush.msra.mxu1 %v96_v1  ;;  %v94_v4 = vld [vmem:[#allocation5] sm:$0xff]  ;;  %v155_v8 = vld [vmem:[#allocation8 + $0x10] sm:$0xff]  ;;  %vm161_vm2 = vcmask 261120   ;;  %vm191_vm3 = vcmask 254976   ;;  %vm200_vm4 = vcmask 1024  }
  0x17   :  { %118 = vmatpush.msra.mxu0 %v98_v3  ;;  %v97_v5 = vld [vmem:[#allocation3] sm:$0x3]  ;;  %v154_v9 = vld [vmem:[#allocation8 + $0x8] sm:$0xff]  ;;  %v153_v10 = vld [vmem:[#allocation8] sm:$0xff] }
  0x18   :  { %209 = vmatmul.msk.f32.vlgmr.msra.gmra.mxu0 %vm99_vm0, %v97_v5  ;;  %141 = vmatpush.msra.mxu1 %v95_v2  ;;  %v93_v6 = vld [vmem:[%s410_s0] sm:$0x3] }
  0x19   :  { %v156_v7 = vld [vmem:[#allocation8 + $0x18] sm:$0xff] }
  0x1a   :  { %142 = vmatpush.msra.mxu1 %v94_v4  ;;  %177 = vmatpush.msra.mxu2 %v156_v7  ;;  %v218_v12 = vld [vmem:[%s414_s4] ss:$0 sm:$0xff] }
  0x1b   :  { %210 = vmatmul.msk.f32.vlgmr.msra.gmra.mxu1 %vm123_vm1, %v93_v6  ;;  %v219_v17 = vld [vmem:[%s416_s6] ss:$0 sm:$0xff] }
  0x1c   :  { %178 = vmatpush.msra.mxu2 %v155_v8  ;;  %v220_v20 = vld [vmem:[%s417_s7] ss:$0 sm:$0xff] }
  0x1d   :  { %v221_v24 = vld [vmem:[#allocation2] ss:$0 sm:$0xff] }
  0x1e   :  { %179 = vmatpush.msra.mxu2 %v154_v9 }
  0x20   :  { %180 = vmatpush.msra.mxu2 %v153_v10 }
  0x95   :  { %v120_v11 = vpop.f32.mrf.mxu0 }
  0x98   :  { %v144_v13 = vpop.f32.mrf.mxu1 }
  0x99   :  { %v145_v14 = vadd.f32 %v144_v13, %v120_v11 }
  0x9b   :  { %v151_v15 = vadd.f32 %v218_v12, %v145_v14 }
  0x9d   :  { %v152_v16 = vmax.f32 %v151_v15, 0.0 }
  0x9f   :  { %211 = vmatmul.msk.f32.vlgmr.msra.gmra.mxu2 %vm161_vm2, %v152_v16 }
 0x122   :  { %v182_v18 = vpop.f32.mrf.mxu2 }
 0x123   :  { %v183_v19 = vadd.f32 %v219_v17, %v182_v18 }
 0x125   :  { %v185_v21 = vmax.f32 %v183_v19, 0.0 }
 0x127   :  { %v190_v22 = vmul.f32 %v220_v20, %v185_v21 }
 0x129   :  { %v192_v23 = vsel %vm191_vm3, %v190_v22, 0.0 }
 0x12a   :  { %193 = vadd.xlane.f32.xlu0 %v192_v23 }
 0x19d   :  { %v194_v25 = vpop.xlane.xlu0 %193 }
 0x19e   :  { %v199_v26 = vadd.f32 %v221_v24, %v194_v25 }
 0x1a0   :  { %201 = vst.msk [vmem:[%s419_s9] sm:$0x3] %vm200_vm4, %v199_v26 }
 0x1a1   :  { %206 = vsyncpa [#allocation4], 1 }
 0x1a2   :  { %207 = vsyncpa [#allocation6], 1 }
 0x1a3   :  { %208 = vsyncpa [#allocation9], 1 }

</bundles_post_ra>
